<compile_context>
chip_gen: v6e
topology: v6e:2x2x1
jax: 0.10.0
libtpu: 0.0.40
codegen_flags: <defaults>
</compile_context>

<pallas_src>
import numpy as np
import jax
import jax.numpy as jnp
from jax.experimental import pallas as pl
from jax.experimental.pallas import tpu as pltpu


def _droppath_kernel(scale_ref, x_ref, o_ref):
    # scale_ref: (TB, 1) f32 per-sample scale (mask / keep_prob).
    # x_ref / o_ref: (TB, TN) tile of the flattened per-sample slabs.
    # Compute in f32, cast once at the store.
    o_ref[...] = (x_ref[...].astype(jnp.float32) * scale_ref[...]).astype(o_ref.dtype)


def _ceil_div(a, b):
    return -(-a // b)


def _round_up(a, b):
    return _ceil_div(a, b) * b


# Tiling targets. _TARGET_TILE_BYTES is per buffer; with in+out double
# buffering the scratch footprint is ~4x this (~8 MiB), well under every
# generation's scoped-VMEM default, so no vmem_limit_bytes override is needed.
_TARGET_TILE_BYTES = 2 * 1024 * 1024
_MIN_GRID_STEPS = 8              # give v7x's two TensorCores something to split
_MIN_SPLIT_TILE_BYTES = 256 * 1024  # never shrink tiles below this just for step count


def drop_path_pallas(x, drop_prob: float, training: bool, key, *, donate_x: bool = False):
    """DropPath forward. x: (B, ...). Returns array of same shape/dtype."""
    if drop_prob == 0.0 or not training:
        return x

    keep_prob = 1.0 - drop_prob
    B = x.shape[0]
    n = int(np.prod(x.shape[1:]))
    itemsize = x.dtype.itemsize

    # Per-sample binary keep mask + scale, always computed in float32.
    u = jax.random.uniform(key, (B,), dtype=jnp.float32)
    scale = (jnp.floor(keep_prob + u) / keep_prob).reshape(B, 1)   # (B, 1) f32

    # Flatten per sample; no padding — boundary tiles are masked by Pallas.
    xf = x.reshape(B, n)

    # ---- batch (sublane) tile: multiple of 8, or the full batch ----
    want_tb = max(1, _TARGET_TILE_BYTES // max(1, n * itemsize))
    if B <= 8 or want_tb >= B:
        tb = B
    else:
        tb = max(8, min((want_tb // 8) * 8, (B // 8) * 8))
    nb = _ceil_div(B, tb)

    # ---- column (lane) tile: multiple of 128, or the full row ----
    if n <= 128:
        tn, nc = n, 1
    else:
        max_tn = max(128, (_TARGET_TILE_BYTES // max(1, tb * itemsize) // 128) * 128)
        want_for_size = _ceil_div(n, max_tn)
        # Ask for >= _MIN_GRID_STEPS total steps (v7x 2-TC split), but only while
        # each resulting tile still moves >= _MIN_SPLIT_TILE_BYTES.
        useful_tiles = max(1, (tb * n * itemsize) // _MIN_SPLIT_TILE_BYTES)
        want_for_steps = min(_ceil_div(_MIN_GRID_STEPS, nb), useful_tiles)
        nc = min(_ceil_div(n, 128), max(want_for_size, want_for_steps))
        if nc <= 1:
            tn, nc = n, 1
        else:
            tn = _round_up(_ceil_div(n, nc), 128)   # balanced tiles, no 1-row tail step
            nc = _ceil_div(n, tn)
            if nc <= 1:
                tn, nc = n, 1

    out = pl.pallas_call(
        _droppath_kernel,
        out_shape=jax.ShapeDtypeStruct((B, n), x.dtype),
        grid_spec=pltpu.PrefetchScalarGridSpec(
            num_scalar_prefetch=0,
            grid=(nb, nc),
            in_specs=[
                pl.BlockSpec((tb, 1), lambda bi, ci: (bi, 0)),     # per-sample scale
                pl.BlockSpec((tb, tn), lambda bi, ci: (bi, ci)),   # x tile
            ],
            out_specs=pl.BlockSpec((tb, tn), lambda bi, ci: (bi, ci)),
        ),
        compiler_params=pltpu.CompilerParams(
            dimension_semantics=("parallel", "parallel"),
        ),
        input_output_aliases=({1: 0} if donate_x else {}),
    )(scale, xf)

    return out.reshape(x.shape)
    # TODO(synk): per-sample dropped-input DMA skip (memory_space=pl.ANY + manual
    # make_async_copy under pl.when(scale != 0)) is not applied because batch-packed
    # (TB, TN) tiles mix kept and dropped samples; revisit for very large per-sample
    # slabs at high stochastic-depth rates.


if __name__ == "__main__":
    key = jax.random.PRNGKey(0)
    kx, kmask = jax.random.split(key)

    drop_prob = 0.25

    def reference(xv, k, p):
        kp = 1.0 - p
        uu = jax.random.uniform(k, (xv.shape[0],), dtype=jnp.float32)
        m = jnp.floor(kp + uu).reshape((xv.shape[0],) + (1,) * (xv.ndim - 1))
        return ((xv.astype(jnp.float32) / kp) * m).astype(xv.dtype)

    # 1) Small NCHW input consistent with the module's usage (lane-aligned n=1024).
    B, C, H, W = 2, 4, 16, 16
    x = jax.random.normal(kx, (B, C, H, W), dtype=jnp.float32)
    out = jax.block_until_ready(drop_path_pallas(x, drop_prob, True, kmask))
    assert out.shape == x.shape and out.dtype == x.dtype
    np.testing.assert_allclose(np.asarray(out), np.asarray(reference(x, kmask, drop_prob)),
                               rtol=1e-5, atol=1e-6)

    # 2) Eval / drop_prob == 0 paths are identity.
    np.testing.assert_allclose(np.asarray(drop_path_pallas(x, drop_prob, False, kmask)),
                               np.asarray(x))
    np.testing.assert_allclose(np.asarray(drop_path_pallas(x, 0.0, True, kmask)),
                               np.asarray(x))

    # 3) Non-lane-aligned per-sample size (3*7*7 = 147): no pad/slice, masked boundary.
    x2 = jax.random.normal(kx, (2, 3, 7, 7), dtype=jnp.float32)
    out2 = jax.block_until_ready(drop_path_pallas(x2, drop_prob, True, kmask))
    np.testing.assert_allclose(np.asarray(out2), np.asarray(reference(x2, kmask, drop_prob)),
                               rtol=1e-5, atol=1e-6)

    # 4) bf16 input: scale stays f32 until the final cast.
    x3 = jax.random.normal(kx, (8, 4, 16, 16), dtype=jnp.bfloat16)
    out3 = jax.block_until_ready(drop_path_pallas(x3, drop_prob, True, kmask))
    ref3 = reference(x3, kmask, drop_prob)
    np.testing.assert_allclose(np.asarray(out3.astype(jnp.float32)),
                               np.asarray(ref3.astype(jnp.float32)),
                               rtol=2e-2, atol=1e-2)

    # 5) Batch > 8 exercises the multiple-of-8 / full-batch batch-tiling path.
    x4 = jax.random.normal(kx, (16, 4, 16, 16), dtype=jnp.float32)
    out4 = jax.block_until_ready(drop_path_pallas(x4, drop_prob, True, kmask))
    np.testing.assert_allclose(np.asarray(out4), np.asarray(reference(x4, kmask, drop_prob)),
                               rtol=1e-5, atol=1e-6)

    print("KERNEL_OK")
</pallas_src>

<mosaic_0001>
module attributes {stable_mosaic.version = 11 : i64} {
  func.func @_droppath_kernel(%arg0: i32, %arg1: i32, %arg2: memref<2x1xf32, #tpu.memory_space<vmem>>, %arg3: memref<2x1024xf32, #tpu.memory_space<vmem>>, %arg4: memref<2x1024xf32, #tpu.memory_space<vmem>>) attributes {dimension_semantics = [#tpu.dimension_semantics<parallel>, #tpu.dimension_semantics<parallel>], iteration_bounds = array<i64: 1, 1>, scalar_prefetch = 0 : i64, scratch_operands = 0 : i64, tpu.core_type = #tpu.core_type<tc>, window_params = [{transform_indices = @transform_0, window_bounds = array<i64: 2, 1>}, {transform_indices = @transform_1, window_bounds = array<i64: 2, 1024>}, {transform_indices = @transform_2, window_bounds = array<i64: 2, 1024>}]} {
    %c0 = arith.constant 0 : index
    %c0_0 = arith.constant 0 : index
    %0 = vector.load %arg3[%c0, %c0_0] : memref<2x1024xf32, #tpu.memory_space<vmem>>, vector<2x1024xf32>
    %c0_1 = arith.constant 0 : index
    %c0_2 = arith.constant 0 : index
    %1 = vector.load %arg2[%c0_1, %c0_2] : memref<2x1xf32, #tpu.memory_space<vmem>>, vector<2x1xf32>
    %2 = vector.broadcast %1 : vector<2x1xf32> to vector<2x1024xf32>
    %3 = arith.mulf %0, %2 : vector<2x1024xf32>
    %c0_3 = arith.constant 0 : index
    %c0_4 = arith.constant 0 : index
    %4 = vector.load %arg4[%c0_3, %c0_4] : memref<2x1024xf32, #tpu.memory_space<vmem>>, vector<2x1024xf32>
    tpu.vector_store %arg4[%c0_3, %c0_4], %3 {strides = array<i32>} : memref<2x1024xf32, #tpu.memory_space<vmem>>, vector<2x1024xf32>,
    return
  }
  func.func @transform_0(%arg0: i32, %arg1: i32) -> (i32, i32) {
    %c0_i32 = arith.constant 0 : i32
    %c0_i32_0 = arith.constant 0 : i32
    return %arg0, %c0_i32 : i32, i32
  }
  func.func @transform_1(%arg0: i32, %arg1: i32) -> (i32, i32) {
    %c0_i32 = arith.constant 0 : i32
    return %arg0, %arg1 : i32, i32
  }
  func.func @transform_2(%arg0: i32, %arg1: i32) -> (i32, i32) {
    %c0_i32 = arith.constant 0 : i32
    return %arg0, %arg1 : i32, i32
  }
}

</mosaic_0001>

<bundles_post_ra>
// kernel: tpu_custom_call.1
= control target key start
LH: loop header
LB: loop body
LE: loop exit
PB: predicated region body
PF: predicated region fallthrough
CT: control target
= control target key end

     0   :  { %7 = vsyncpa [#allocation3], 0  ;;  %s135_s0 = inlined_call_operand.vmem [shape: f32[2,1], index: 0, kind: input, shape index: {}]   ;;  %s136_s1 = inlined_call_operand.hbm [shape: f32[2,1024], index: 1, kind: input, shape index: {}]   ;;  %s137_s2 = inlined_call_operand.hbm [shape: f32[2,1024], index: 2, kind: output, shape index: {}]  }
   0x1   :  { %8 = vsyncpa [#allocation4], 0  ;;  %s107_s9 = smov [#allocation2]  }
   0x2   :  { %s17_s10 = sshll.u32 %s107_s9, 4  ;;  %s18_s10 = int_to_ptr.vmem [resolvable:$true] %s17_s10 }
   0x3   :  { %s71_s11 = scalar_lea.vmem %s18_s10, 256  ;;  %p76_p1 = scmp.lt.s32.totalorder %s18_s10, %s18_s10 }
   0x4   :  { %p72_p0 = scmp.ne.s32.totalorder %s18_s10, %s71_s11  ;;  %p77_p2 = scmp.lt.s32.totalorder %s71_s11, %s71_s11 }
   0x6   :  { %p78_p3 = por %p77_p2, %p76_p1 }
   0x8   :  { %p79_p4 = pnand %p78_p3, %p72_p0 }
   0xa   :  { %82 = shalt.err (!%p79_p4)
}
   0xb   :  { %20 = dma.hbm_to_vmem [thread:$0]  %s136_s1, 256, %s18_s10, [#allocation3]  }
   0xc   :  { %103 = dma.done.wait [#allocation3], 256  }
   0xd   :  { %104 = vsyncadd [#allocation3], 4294967040  ;;  %v108_v0 = vmov 0   ;;  %v26_v1 = vld [vmem:[%s135_s0] sm:$0x3]  ;;  %v34_v4 = vlaneseq  ;;  %v25_v10 = vld [vmem:[#allocation2 + $0x8] sm:$0xff] }
   0xe   :  { %62 = vset.pattern.permute.xlu0 %v108_v0  ;;  %v109_v2 = vmov 269488144   ;;  %v24_v9 = vld [vmem:[#allocation2] sm:$0xff]  ;;  %s110_s16 = smov [#allocation5]  }
   0xf   :  { %29 = vperm.xlu0 %62, %v26_v1   ;;  %v32_v3 = vunpack.c.l.s4 %v109_v2  ;;  %v35_v6 = vshrl.u32 %v34_v4, 7  ;;  %s49_s1 = sshll.u32 %s110_s16, 4  ;;  %s50_s1 = int_to_ptr.vmem [resolvable:$true] %s49_s1 }
  0x10   :  { %s83_s17 = scalar_lea.vmem %s50_s1, 256  ;;  %p88_p6 = scmp.lt.s32.totalorder %s50_s1, %s50_s1 }
  0x11   :  { %v33_v5 = vunpack.c.0.s8 %v32_v3  ;;  %p84_p5 = scmp.ne.s32.totalorder %s50_s1, %s83_s17  ;;  %p89_p7 = scmp.lt.s32.totalorder %s83_s17, %s83_s17 }
  0x13   :  { %v36_v7 = vsub.s32 %v33_v5, %v35_v6  ;;  %p90_p8 = por %p89_p7, %p88_p6 }
  0x15   :  { %p91_p9 = pnand %p90_p8, %p84_p5 }
  0x8a   :  { %v30_v8 = vpop.permute.xlu0 %29 }
  0x8b   :  { %v37_v11 = vrot.slane %v30_v8, %v36_v7 }
  0x8d   :  { %v39_v12 = vmul.f32 %v37_v11, %v24_v9  ;;  %v40_v13 = vmul.f32 %v37_v11, %v25_v10 }
  0x8f   :  { %41 = vst [vmem:[#allocation5] sm:$0xff] %v39_v12  ;;  %42 = vst [vmem:[#allocation5 + $0x8] sm:$0xff] %v40_v13 }
  0x90   :  { %94 = shalt.err (!%p91_p9)
}
  0x91   :  { %52 = dma.vmem_to_hbm [thread:$0]  %s50_s1, 256, %s137_s2, [#allocation4]  }
  0x92   :  { %105 = dma.done.wait [#allocation4], 256  }
  0x93   :  { %106 = vsyncadd [#allocation4], 4294967040 }
  0x94   :  { %56 = vsyncpa [#allocation3], 1 }
  0x95   :  { %57 = vsyncpa [#allocation4], 1 }

</bundles_post_ra>
